<compile_context>
chip_gen: v7x
topology: tpu7x:2x2x1
jax: 0.10.0
libtpu: 0.0.40
codegen_flags: <defaults>
</compile_context>

<pallas_src>
import functools
import math

import jax
import jax.numpy as jnp
from jax.experimental import pallas as pl
from jax.experimental.pallas import tpu as pltpu


def _patch_merging_kernel(x_ref, we_ref, wo_ref, cs_ref, b_ref, o_ref, *,
                          c, w2, g, eps, mm_dtype):
    # x_ref : (rows, 2*w*c)   one output row's two source image rows, flattened
    # we_ref: (g*2c, g*2c)    block-diag even-row weight  (rows = [x0; x2] order)
    # wo_ref: (g*2c, g*2c)    block-diag odd-row  weight  (rows = [x1; x3] order)
    # cs_ref: (1, g*2c)       column sums of W' (tiled g times), f32
    # b_ref : (1, g*2c)       beta @ W.T (tiled g times), f32
    # o_ref : (rows, w2*2c)   merged + normalized + reduced output rows
    rows = x_ref.shape[0]
    tc = 2 * c                       # channels of one half-token ([x0|x2] / [x1|x3])
    in_cl = g * tc                   # lanes per chunk (multiple of 128 on the fast path)
    half = w2 * tc                   # lane offset of the odd-source-row half (= w*c)
    nchunks = w2 // g
    inv4c = 1.0 / (4 * c)
    align = math.gcd(in_cl, 128)

    # Loop-invariant operands: loaded once, reused for every chunk.
    w_e = we_ref[...]
    w_o = wo_ref[...]
    cs = cs_ref[...]                 # (1, in_cl) f32
    bias = b_ref[...]                # (1, in_cl) f32

    def compute_chunk(off):
        xe = x_ref[:, pl.ds(off, in_cl)]            # even source row: g x [x0|x2]
        xo = x_ref[:, pl.ds(half + off, in_cl)]     # odd  source row: g x [x1|x3]

        # Raw-data matmuls on the MXU (LN folded into a post-matmul correction).
        acc = jnp.dot(xe.astype(mm_dtype), w_e, preferred_element_type=jnp.float32)
        acc = acc + jnp.dot(xo.astype(mm_dtype), w_o,
                            preferred_element_type=jnp.float32)

        # Per-token LN statistics (f32), single pass: sum and sum-of-squares.
        xef = xe.astype(jnp.float32)
        xof = xo.astype(jnp.float32)
        t1 = xef + xof
        t2 = xef * xef + xof * xof
        rstd_parts = []
        rmu_parts = []
        for j in range(g):                           # g is 1 or 2 in practice
            s = jnp.sum(t1[:, j * tc:(j + 1) * tc], axis=-1, keepdims=True)
            q = jnp.sum(t2[:, j * tc:(j + 1) * tc], axis=-1, keepdims=True)
            mu = s * inv4c
            var = jnp.maximum(q * inv4c - mu * mu, 0.0)
            rstd = jax.lax.rsqrt(var + eps)
            rstd_parts.append(jnp.broadcast_to(rstd, (rows, tc)))
            rmu_parts.append(jnp.broadcast_to(rstd * mu, (rows, tc)))
        if g > 1:
            rstd_f = jnp.concatenate(rstd_parts, axis=-1)
            rmu_f = jnp.concatenate(rmu_parts, axis=-1)
        else:
            rstd_f, rmu_f = rstd_parts[0], rmu_parts[0]

        out = rstd_f * acc - rmu_f * cs + bias
        # Aligned, unmasked store: off and in_cl are multiples of 128 on the fast path.
        o_ref[:, pl.ds(off, in_cl)] = out.astype(o_ref.dtype)

    if nchunks <= 4:
        # Tiny column count: fully static offsets, best codegen, bounded temps.
        for k in range(nchunks):
            compute_chunk(k * in_cl)
    else:
        # Real Swin shapes (w2 = 14..56): bound live ranges with fori_loop.
        def body(k, carry):
            compute_chunk(pl.multiple_of(k * in_cl, align))
            return carry
        jax.lax.fori_loop(0, nchunks, body, 0,
                          unroll=2 if nchunks % 2 == 0 else 1)


def _pick_rows(rows_total, w2, per_row_bytes, vmem_cap, target_tokens):
    """Rows of the (b*h/2, 2*w*c) view per grid step (multiple of 8 or full)."""
    if rows_total <= 8:
        return rows_total
    # Keep double-buffered in+out tiles within ~55% of physical VMEM.
    allow = max(4 * 1024 * 1024, int(vmem_cap * 0.55))
    rows_cap = max(8, (allow // max(1, 2 * per_row_bytes)) // 8 * 8)
    rows = max(8, -(-max(1, target_tokens // max(1, w2)) // 8) * 8)
    rows = min(rows, rows_cap, rows_total)
    if rows >= rows_total:
        return rows_total
    # Best effort: even number of grid steps (v7x has 2 TCs on the parallel axis).
    for r in range(rows, max(8, rows - 64) - 1, -8):
        if (-(-rows_total // r)) % 2 == 0:
            return r
    return rows


def patch_merging_forward(x, input_resolution, gamma, beta, w_reduction,
                          eps=1e-5, target_tokens=4096, mm_dtype=None):
    """x: (b, h*w, c)  ->  (b, (h/2)*(w/2), 2*c).  Matches PatchMerging.forward."""
    h, w = input_resolution
    b, seq_len, c = x.shape
    assert seq_len == h * w, "input feature has wrong size"
    assert h % 2 == 0 and w % 2 == 0, f"x size ({h}*{w}) are not even."
    h2, w2 = h // 2, w // 2
    rows_total = b * h2
    tc = 2 * c

    if mm_dtype is None:
        # bf16 MXU for bf16 models; exact f32 matmul for f32 inputs.
        # (On v5e, passing mm_dtype=jnp.bfloat16 for f32 inputs trades a little
        #  precision for several fewer MXU passes.)
        mm_dtype = jnp.bfloat16 if x.dtype == jnp.bfloat16 else jnp.float32

    # ---- fold the LayerNorm affine into the reduction weight (host, once) ----
    # PyTorch nn.Linear weight is (out, in):   out = LN(m) @ W.T
    w_t = w_reduction.astype(jnp.float32).T                   # (4c, 2c)
    w_fold = gamma.astype(jnp.float32)[:, None] * w_t         # W' = diag(gamma) @ W.T
    cs = jnp.sum(w_fold, axis=0, keepdims=True)               # (1, 2c)
    bias = (beta.astype(jnp.float32) @ w_t).reshape(1, tc)    # (1, 2c)
    # Memory order of one merged token: even source row holds [x0|x2], odd [x1|x3].
    w_even = jnp.concatenate([w_fold[0:c], w_fold[2 * c:3 * c]], axis=0)   # (2c, 2c)
    w_odd = jnp.concatenate([w_fold[c:2 * c], w_fold[3 * c:4 * c]], axis=0)

    # ---- aligned chunking factor g: smallest divisor of w2 with g*2c % 128 == 0 ----
    g = 1
    for cand in range(1, min(w2, 8) + 1):
        if w2 % cand == 0 and (cand * tc) % 128 == 0:
            g = cand
            break
    in_cl = g * tc
    if g > 1:
        eye = jnp.eye(g, dtype=jnp.float32)
        w_even_g = jnp.kron(eye, w_even)                       # (g*2c, g*2c)
        w_odd_g = jnp.kron(eye, w_odd)
        cs_g = jnp.tile(cs, (1, g))
        bias_g = jnp.tile(bias, (1, g))
    else:
        # TODO(synk): g == 1 with 2c % 128 != 0 leaves lane-misaligned chunk
        # slices (still correct, just slower); only hit for unusual channel counts.
        w_even_g, w_odd_g, cs_g, bias_g = w_even, w_odd, cs, bias
    w_even_g = w_even_g.astype(mm_dtype)
    w_odd_g = w_odd_g.astype(mm_dtype)
    cs_g = cs_g.astype(jnp.float32)
    bias_g = bias_g.astype(jnp.float32)

    # ---- free contiguous view: read x once, write the output once ----
    x_rows = x.reshape(rows_total, 2 * w * c)

    itemsize = x.dtype.itemsize
    per_row_bytes = (2 * w * c + w2 * tc) * itemsize
    try:
        vmem_cap = int(getattr(pltpu.get_tpu_info(), "vmem_capacity_bytes",
                               64 * 1024 * 1024))
    except Exception:
        vmem_cap = 64 * 1024 * 1024                            # v7x-safe default
    rows = _pick_rows(rows_total, w2, per_row_bytes, vmem_cap, target_tokens)
    grid_m = pl.cdiv(rows_total, rows)

    in_tile = rows * 2 * w * c * itemsize
    out_tile = rows * w2 * tc * itemsize
    weight_bytes = int((w_even_g.size + w_odd_g.size) * w_even_g.dtype.itemsize
                       + (cs_g.size + bias_g.size) * 4)
    need = 2 * (in_tile + out_tile) + 4 * weight_bytes + 8 * 1024 * 1024
    vmem_limit = int(min(max(need, 16 * 1024 * 1024), int(vmem_cap * 0.9)))

    kernel = functools.partial(_patch_merging_kernel, c=c, w2=w2, g=g, eps=eps,
                               mm_dtype=mm_dtype)

    m_tokens = rows_total * w2
    out_rows = pl.pallas_call(
        kernel,
        out_shape=jax.ShapeDtypeStruct((rows_total, w2 * tc), x.dtype),
        grid_spec=pltpu.PrefetchScalarGridSpec(
            num_scalar_prefetch=0,
            grid=(grid_m,),
            in_specs=[
                pl.BlockSpec((rows, 2 * w * c), lambda i: (i, 0)),   # x row block
                pl.BlockSpec((in_cl, in_cl), lambda i: (0, 0)),      # even-row weight
                pl.BlockSpec((in_cl, in_cl), lambda i: (0, 0)),      # odd-row weight
                pl.BlockSpec((1, in_cl), lambda i: (0, 0)),          # colsum(W')
                pl.BlockSpec((1, in_cl), lambda i: (0, 0)),          # beta @ W.T
            ],
            out_specs=pl.BlockSpec((rows, w2 * tc), lambda i: (i, 0)),
        ),
        compiler_params=pltpu.CompilerParams(
            dimension_semantics=("parallel",),
            vmem_limit_bytes=vmem_limit,
        ),
        cost_estimate=pl.CostEstimate(
            flops=int(2 * m_tokens * (4 * c) * tc * g + 8 * m_tokens * 4 * c),
            transcendentals=int(m_tokens),
            bytes_accessed=int((x.size + rows_total * w2 * tc) * itemsize
                               + weight_bytes),
        ),
    )(x_rows, w_even_g, w_odd_g, cs_g, bias_g)

    return out_rows.reshape(b, h2 * w2, tc)


def _reference_forward(x, input_resolution, gamma, beta, w_reduction, eps=1e-5):
    h, w = input_resolution
    b, _, c = x.shape
    xv = x.reshape(b, h, w, c)
    x0 = xv[:, 0::2, 0::2, :]
    x1 = xv[:, 1::2, 0::2, :]
    x2 = xv[:, 0::2, 1::2, :]
    x3 = xv[:, 1::2, 1::2, :]
    m = jnp.concatenate([x0, x1, x2, x3], -1).reshape(b, -1, 4 * c)
    mean = jnp.mean(m, axis=-1, keepdims=True)
    var = jnp.mean((m - mean) ** 2, axis=-1, keepdims=True)
    mn = (m - mean) / jnp.sqrt(var + eps) * gamma + beta
    return jnp.einsum("bnk,ok->bno", mn, w_reduction,
                      precision=jax.lax.Precision.HIGHEST)


if __name__ == "__main__":
    # Small shapes consistent with the module: b=2, dim=32, input_resolution=(8, 8)
    b = 2
    dim = 32
    H, W = 8, 8

    key = jax.random.PRNGKey(0)
    kx, kg, kb, kw = jax.random.split(key, 4)

    x = jax.random.normal(kx, (b, H * W, dim), dtype=jnp.float32)

    # LayerNorm(4*dim) affine + Linear(4*dim -> 2*dim, bias=False) weight
    gamma = jnp.ones((4 * dim,), jnp.float32) + 0.01 * jax.random.normal(kg, (4 * dim,))
    beta = 0.01 * jax.random.normal(kb, (4 * dim,))
    w_reduction = 0.02 * jax.random.normal(kw, (2 * dim, 4 * dim), dtype=jnp.float32)

    out = patch_merging_forward(x, (H, W), gamma, beta, w_reduction)
    out = jax.block_until_ready(out)

    ref = _reference_forward(x, (H, W), gamma, beta, w_reduction)
    assert out.shape == (b, (H // 2) * (W // 2), 2 * dim), out.shape
    max_err = float(jnp.max(jnp.abs(out - ref)))
    assert jnp.allclose(out, ref, atol=2e-3, rtol=2e-3), max_err

    print("KERNEL_OK")
</pallas_src>

<mosaic_0001>
module attributes {stable_mosaic.version = 11 : i64} {
  func.func @_patch_merging_kernel(%arg0: i32, %arg1: memref<8x512xf32, #tpu.memory_space<vmem>>, %arg2: memref<128x128xf32, #tpu.memory_space<vmem>>, %arg3: memref<128x128xf32, #tpu.memory_space<vmem>>, %arg4: memref<1x128xf32, #tpu.memory_space<vmem>>, %arg5: memref<1x128xf32, #tpu.memory_space<vmem>>, %arg6: memref<8x256xf32, #tpu.memory_space<vmem>>) attributes {dimension_semantics = [#tpu.dimension_semantics<parallel>], iteration_bounds = array<i64: 1>, scalar_prefetch = 0 : i64, scratch_operands = 0 : i64, tpu.core_type = #tpu.core_type<tc>, window_params = [{transform_indices = @transform_0, window_bounds = array<i64: 8, 512>}, {pipeline_mode = #tpu.pipeline_mode<synchronous>, transform_indices = @transform_1, window_bounds = array<i64: 128, 128>}, {pipeline_mode = #tpu.pipeline_mode<synchronous>, transform_indices = @transform_2, window_bounds = array<i64: 128, 128>}, {pipeline_mode = #tpu.pipeline_mode<synchronous>, transform_indices = @transform_3, window_bounds = array<i64: 1, 128>}, {pipeline_mode = #tpu.pipeline_mode<synchronous>, transform_indices = @transform_4, window_bounds = array<i64: 1, 128>}, {transform_indices = @transform_5, window_bounds = array<i64: 8, 256>}]} {
    %c0 = arith.constant 0 : index
    %c0_0 = arith.constant 0 : index
    %0 = vector.load %arg2[%c0, %c0_0] : memref<128x128xf32, #tpu.memory_space<vmem>>, vector<128x128xf32>
    %c0_1 = arith.constant 0 : index
    %c0_2 = arith.constant 0 : index
    %1 = vector.load %arg3[%c0_1, %c0_2] : memref<128x128xf32, #tpu.memory_space<vmem>>, vector<128x128xf32>
    %c0_3 = arith.constant 0 : index
    %c0_4 = arith.constant 0 : index
    %2 = vector.load %arg4[%c0_3, %c0_4] : memref<1x128xf32, #tpu.memory_space<vmem>>, vector<1x128xf32>
    %c0_5 = arith.constant 0 : index
    %c0_6 = arith.constant 0 : index
    %3 = vector.load %arg5[%c0_5, %c0_6] : memref<1x128xf32, #tpu.memory_space<vmem>>, vector<1x128xf32>
    %c0_7 = arith.constant 0 : index
    %c0_8 = arith.constant 0 : index
    %4 = vector.load %arg1[%c0_7, %c0_8] : memref<8x512xf32, #tpu.memory_space<vmem>>, vector<8x128xf32>
    %c0_9 = arith.constant 0 : index
    %c256 = arith.constant 256 : index
    %5 = vector.load %arg1[%c0_9, %c256] : memref<8x512xf32, #tpu.memory_space<vmem>>, vector<8x128xf32>
    %cst = arith.constant dense<0.000000e+00> : vector<8x128xf32>
    %6 = tpu.matmul %4, %0, %cst {dimension_numbers = #tpu.dot_dimension_numbers<[1], [0], [0], [1], [0, 0, 1, 1], [], []>} : vector<8x128xf32>, vector<128x128xf32>, vector<8x128xf32> -> vector<8x128xf32>
    %cst_10 = arith.constant dense<0.000000e+00> : vector<8x128xf32>
    %7 = tpu.matmul %5, %1, %cst_10 {dimension_numbers = #tpu.dot_dimension_numbers<[1], [0], [0], [1], [0, 0, 1, 1], [], []>} : vector<8x128xf32>, vector<128x128xf32>, vector<8x128xf32> -> vector<8x128xf32>
    %8 = arith.addf %6, %7 : vector<8x128xf32>
    %9 = arith.addf %4, %5 : vector<8x128xf32>
    %10 = arith.mulf %4, %4 : vector<8x128xf32>
    %11 = arith.mulf %5, %5 : vector<8x128xf32>
    %12 = arith.addf %10, %11 : vector<8x128xf32>
    %13 = vector.extract_strided_slice %9 {offsets = [0, 0], sizes = [8, 64], strides = [1, 1]} : vector<8x128xf32> to vector<8x64xf32>
    %cst_11 = arith.constant dense<0.000000e+00> : vector<8xf32>
    %14 = vector.multi_reduction <add>, %13, %cst_11 [1] : vector<8x64xf32> to vector<8xf32>
    %15 = vector.shape_cast %14 : vector<8xf32> to vector<8x1xf32>
    %16 = vector.extract_strided_slice %12 {offsets = [0, 0], sizes = [8, 64], strides = [1, 1]} : vector<8x128xf32> to vector<8x64xf32>
    %cst_12 = arith.constant dense<0.000000e+00> : vector<8xf32>
    %17 = vector.multi_reduction <add>, %16, %cst_12 [1] : vector<8x64xf32> to vector<8xf32>
    %18 = vector.shape_cast %17 : vector<8xf32> to vector<8x1xf32>
    %cst_13 = arith.constant 7.812500e-03 : f32
    %19 = vector.broadcast %cst_13 : f32 to vector<8x1xf32>
    %20 = arith.mulf %15, %19 : vector<8x1xf32>
    %cst_14 = arith.constant 7.812500e-03 : f32
    %21 = vector.broadcast %cst_14 : f32 to vector<8x1xf32>
    %22 = arith.mulf %18, %21 : vector<8x1xf32>
    %23 = arith.mulf %20, %20 : vector<8x1xf32>
    %24 = arith.subf %22, %23 : vector<8x1xf32>
    %cst_15 = arith.constant 0.000000e+00 : f32
    %25 = vector.broadcast %cst_15 : f32 to vector<8x1xf32>
    %26 = arith.maximumf %24, %25 : vector<8x1xf32>
    %cst_16 = arith.constant 9.99999974E-6 : f32
    %27 = vector.broadcast %cst_16 : f32 to vector<8x1xf32>
    %28 = arith.addf %26, %27 : vector<8x1xf32>
    %29 = math.rsqrt %28 : vector<8x1xf32>
    %30 = vector.shape_cast %29 : vector<8x1xf32> to vector<8x1xf32>
    %31 = vector.broadcast %30 : vector<8x1xf32> to vector<8x64xf32>
    %32 = arith.mulf %29, %20 : vector<8x1xf32>
    %33 = vector.shape_cast %32 : vector<8x1xf32> to vector<8x1xf32>
    %34 = vector.broadcast %33 : vector<8x1xf32> to vector<8x64xf32>
    %35 = vector.extract_strided_slice %9 {offsets = [0, 64], sizes = [8, 64], strides = [1, 1]} : vector<8x128xf32> to vector<8x64xf32>
    %cst_17 = arith.constant dense<0.000000e+00> : vector<8xf32>
    %36 = vector.multi_reduction <add>, %35, %cst_17 [1] : vector<8x64xf32> to vector<8xf32>
    %37 = vector.shape_cast %36 : vector<8xf32> to vector<8x1xf32>
    %38 = vector.extract_strided_slice %12 {offsets = [0, 64], sizes = [8, 64], strides = [1, 1]} : vector<8x128xf32> to vector<8x64xf32>
    %cst_18 = arith.constant dense<0.000000e+00> : vector<8xf32>
    %39 = vector.multi_reduction <add>, %38, %cst_18 [1] : vector<8x64xf32> to vector<8xf32>
    %40 = vector.shape_cast %39 : vector<8xf32> to vector<8x1xf32>
    %cst_19 = arith.constant 7.812500e-03 : f32
    %41 = vector.broadcast %cst_19 : f32 to vector<8x1xf32>
    %42 = arith.mulf %37, %41 : vector<8x1xf32>
    %cst_20 = arith.constant 7.812500e-03 : f32
    %43 = vector.broadcast %cst_20 : f32 to vector<8x1xf32>
    %44 = arith.mulf %40, %43 : vector<8x1xf32>
    %45 = arith.mulf %42, %42 : vector<8x1xf32>
    %46 = arith.subf %44, %45 : vector<8x1xf32>
    %cst_21 = arith.constant 0.000000e+00 : f32
    %47 = vector.broadcast %cst_21 : f32 to vector<8x1xf32>
    %48 = arith.maximumf %46, %47 : vector<8x1xf32>
    %cst_22 = arith.constant 9.99999974E-6 : f32
    %49 = vector.broadcast %cst_22 : f32 to vector<8x1xf32>
    %50 = arith.addf %48, %49 : vector<8x1xf32>
    %51 = math.rsqrt %50 : vector<8x1xf32>
    %52 = vector.shape_cast %51 : vector<8x1xf32> to vector<8x1xf32>
    %53 = vector.broadcast %52 : vector<8x1xf32> to vector<8x64xf32>
    %54 = arith.mulf %51, %42 : vector<8x1xf32>
    %55 = vector.shape_cast %54 : vector<8x1xf32> to vector<8x1xf32>
    %56 = vector.broadcast %55 : vector<8x1xf32> to vector<8x64xf32>
    %57 = tpu.concatenate %31, %53 in 1 : vector<8x64xf32>, vector<8x64xf32> -> vector<8x128xf32>
    %58 = tpu.concatenate %34, %56 in 1 : vector<8x64xf32>, vector<8x64xf32> -> vector<8x128xf32>
    %59 = arith.mulf %57, %8 : vector<8x128xf32>
    %60 = vector.broadcast %2 : vector<1x128xf32> to vector<8x128xf32>
    %61 = arith.mulf %58, %60 : vector<8x128xf32>
    %62 = arith.subf %59, %61 : vector<8x128xf32>
    %63 = vector.broadcast %3 : vector<1x128xf32> to vector<8x128xf32>
    %64 = arith.addf %62, %63 : vector<8x128xf32>
    %c0_23 = arith.constant 0 : index
    %c0_24 = arith.constant 0 : index
    %65 = vector.load %arg6[%c0_23, %c0_24] : memref<8x256xf32, #tpu.memory_space<vmem>>, vector<8x128xf32>
    tpu.vector_store %arg6[%c0_23, %c0_24], %64 {strides = array<i32>} : memref<8x256xf32, #tpu.memory_space<vmem>>, vector<8x128xf32>,
    %c0_25 = arith.constant 0 : index
    %c128 = arith.constant 128 : index
    %66 = vector.load %arg1[%c0_25, %c128] : memref<8x512xf32, #tpu.memory_space<vmem>>, vector<8x128xf32>
    %c0_26 = arith.constant 0 : index
    %c384 = arith.constant 384 : index
    %67 = vector.load %arg1[%c0_26, %c384] : memref<8x512xf32, #tpu.memory_space<vmem>>, vector<8x128xf32>
    %cst_27 = arith.constant dense<0.000000e+00> : vector<8x128xf32>
    %68 = tpu.matmul %66, %0, %cst_27 {dimension_numbers = #tpu.dot_dimension_numbers<[1], [0], [0], [1], [0, 0, 1, 1], [], []>} : vector<8x128xf32>, vector<128x128xf32>, vector<8x128xf32> -> vector<8x128xf32>
    %cst_28 = arith.constant dense<0.000000e+00> : vector<8x128xf32>
    %69 = tpu.matmul %67, %1, %cst_28 {dimension_numbers = #tpu.dot_dimension_numbers<[1], [0], [0], [1], [0, 0, 1, 1], [], []>} : vector<8x128xf32>, vector<128x128xf32>, vector<8x128xf32> -> vector<8x128xf32>
    %70 = arith.addf %68, %69 : vector<8x128xf32>
    %71 = arith.addf %66, %67 : vector<8x128xf32>
    %72 = arith.mulf %66, %66 : vector<8x128xf32>
    %73 = arith.mulf %67, %67 : vector<8x128xf32>
    %74 = arith.addf %72, %73 : vector<8x128xf32>
    %75 = vector.extract_strided_slice %71 {offsets = [0, 0], sizes = [8, 64], strides = [1, 1]} : vector<8x128xf32> to vector<8x64xf32>
    %cst_29 = arith.constant dense<0.000000e+00> : vector<8xf32>
    %76 = vector.multi_reduction <add>, %75, %cst_29 [1] : vector<8x64xf32> to vector<8xf32>
    %77 = vector.shape_cast %76 : vector<8xf32> to vector<8x1xf32>
    %78 = vector.extract_strided_slice %74 {offsets = [0, 0], sizes = [8, 64], strides = [1, 1]} : vector<8x128xf32> to vector<8x64xf32>
    %cst_30 = arith.constant dense<0.000000e+00> : vector<8xf32>
    %79 = vector.multi_reduction <add>, %78, %cst_30 [1] : vector<8x64xf32> to vector<8xf32>
    %80 = vector.shape_cast %79 : vector<8xf32> to vector<8x1xf32>
    %cst_31 = arith.constant 7.812500e-03 : f32
    %81 = vector.broadcast %cst_31 : f32 to vector<8x1xf32>
    %82 = arith.mulf %77, %81 : vector<8x1xf32>
    %cst_32 = arith.constant 7.812500e-03 : f32
    %83 = vector.broadcast %cst_32 : f32 to vector<8x1xf32>
    %84 = arith.mulf %80, %83 : vector<8x1xf32>
    %85 = arith.mulf %82, %82 : vector<8x1xf32>
    %86 = arith.subf %84, %85 : vector<8x1xf32>
    %cst_33 = arith.constant 0.000000e+00 : f32
    %87 = vector.broadcast %cst_33 : f32 to vector<8x1xf32>
    %88 = arith.maximumf %86, %87 : vector<8x1xf32>
    %cst_34 = arith.constant 9.99999974E-6 : f32
    %89 = vector.broadcast %cst_34 : f32 to vector<8x1xf32>
    %90 = arith.addf %88, %89 : vector<8x1xf32>
    %91 = math.rsqrt %90 : vector<8x1xf32>
    %92 = vector.shape_cast %91 : vector<8x1xf32> to vector<8x1xf32>
    %93 = vector.broadcast %92 : vector<8x1xf32> to vector<8x64xf32>
    %94 = arith.mulf %91, %82 : vector<8x1xf32>
    %95 = vector.shape_cast %94 : vector<8x1xf32> to vector<8x1xf32>
    %96 = vector.broadcast %95 : vector<8x1xf32> to vector<8x64xf32>
    %97 = vector.extract_strided_slice %71 {offsets = [0, 64], sizes = [8, 64], strides = [1, 1]} : vector<8x128xf32> to vector<8x64xf32>
    %cst_35 = arith.constant dense<0.000000e+00> : vector<8xf32>
    %98 = vector.multi_reduction <add>, %97, %cst_35 [1] : vector<8x64xf32> to vector<8xf32>
    %99 = vector.shape_cast %98 : vector<8xf32> to vector<8x1xf32>
    %100 = vector.extract_strided_slice %74 {offsets = [0, 64], sizes = [8, 64], strides = [1, 1]} : vector<8x128xf32> to vector<8x64xf32>
    %cst_36 = arith.constant dense<0.000000e+00> : vector<8xf32>
    %101 = vector.multi_reduction <add>, %100, %cst_36 [1] : vector<8x64xf32> to vector<8xf32>
    %102 = vector.shape_cast %101 : vector<8xf32> to vector<8x1xf32>
    %cst_37 = arith.constant 7.812500e-03 : f32
    %103 = vector.broadcast %cst_37 : f32 to vector<8x1xf32>
    %104 = arith.mulf %99, %103 : vector<8x1xf32>
    %cst_38 = arith.constant 7.812500e-03 : f32
    %105 = vector.broadcast %cst_38 : f32 to vector<8x1xf32>
    %106 = arith.mulf %102, %105 : vector<8x1xf32>
    %107 = arith.mulf %104, %104 : vector<8x1xf32>
    %108 = arith.subf %106, %107 : vector<8x1xf32>
    %cst_39 = arith.constant 0.000000e+00 : f32
    %109 = vector.broadcast %cst_39 : f32 to vector<8x1xf32>
    %110 = arith.maximumf %108, %109 : vector<8x1xf32>
    %cst_40 = arith.constant 9.99999974E-6 : f32
    %111 = vector.broadcast %cst_40 : f32 to vector<8x1xf32>
    %112 = arith.addf %110, %111 : vector<8x1xf32>
    %113 = math.rsqrt %112 : vector<8x1xf32>
    %114 = vector.shape_cast %113 : vector<8x1xf32> to vector<8x1xf32>
    %115 = vector.broadcast %114 : vector<8x1xf32> to vector<8x64xf32>
    %116 = arith.mulf %113, %104 : vector<8x1xf32>
    %117 = vector.shape_cast %116 : vector<8x1xf32> to vector<8x1xf32>
    %118 = vector.broadcast %117 : vector<8x1xf32> to vector<8x64xf32>
    %119 = tpu.concatenate %93, %115 in 1 : vector<8x64xf32>, vector<8x64xf32> -> vector<8x128xf32>
    %120 = tpu.concatenate %96, %118 in 1 : vector<8x64xf32>, vector<8x64xf32> -> vector<8x128xf32>
    %121 = arith.mulf %119, %70 : vector<8x128xf32>
    %122 = vector.broadcast %2 : vector<1x128xf32> to vector<8x128xf32>
    %123 = arith.mulf %120, %122 : vector<8x128xf32>
    %124 = arith.subf %121, %123 : vector<8x128xf32>
    %125 = vector.broadcast %3 : vector<1x128xf32> to vector<8x128xf32>
    %126 = arith.addf %124, %125 : vector<8x128xf32>
    %c0_41 = arith.constant 0 : index
    %c128_42 = arith.constant 128 : index
    %127 = vector.load %arg6[%c0_41, %c128_42] : memref<8x256xf32, #tpu.memory_space<vmem>>, vector<8x128xf32>
    tpu.vector_store %arg6[%c0_41, %c128_42], %126 {strides = array<i32>} : memref<8x256xf32, #tpu.memory_space<vmem>>, vector<8x128xf32>,
    return
  }
  func.func @transform_0(%arg0: i32) -> (i32, i32) {
    %c0_i32 = arith.constant 0 : i32
    %c0_i32_0 = arith.constant 0 : i32
    return %arg0, %c0_i32 : i32, i32
  }
  func.func @transform_1(%arg0: i32) -> (i32, i32) {
    %c0_i32 = arith.constant 0 : i32
    %c0_i32_0 = arith.constant 0 : i32
    %c0_i32_1 = arith.constant 0 : i32
    return %c0_i32, %c0_i32_0 : i32, i32
  }
  func.func @transform_2(%arg0: i32) -> (i32, i32) {
    %c0_i32 = arith.constant 0 : i32
    %c0_i32_0 = arith.constant 0 : i32
    %c0_i32_1 = arith.constant 0 : i32
    return %c0_i32, %c0_i32_0 : i32, i32
  }
  func.func @transform_3(%arg0: i32) -> (i32, i32) {
    %c0_i32 = arith.constant 0 : i32
    %c0_i32_0 = arith.constant 0 : i32
    %c0_i32_1 = arith.constant 0 : i32
    return %c0_i32, %c0_i32_0 : i32, i32
  }
  func.func @transform_4(%arg0: i32) -> (i32, i32) {
    %c0_i32 = arith.constant 0 : i32
    %c0_i32_0 = arith.constant 0 : i32
    %c0_i32_1 = arith.constant 0 : i32
    return %c0_i32, %c0_i32_0 : i32, i32
  }
  func.func @transform_5(%arg0: i32) -> (i32, i32) {
    %c0_i32 = arith.constant 0 : i32
    %c0_i32_0 = arith.constant 0 : i32
    return %arg0, %c0_i32 : i32, i32
  }
}

</mosaic_0001>

<bundles_post_ra>
// kernel: tpu_custom_call.1
= control target key start
LH: loop header
LB: loop body
LE: loop exit
PB: predicated region body
PF: predicated region fallthrough
CT: control target
= control target key end

     0   :  { %10 = vsyncpa [#allocation3], 0  ;;  %s1115_s0 = inlined_call_operand.hbm [shape: f32[8,512], index: 0, kind: input, shape index: {}]   ;;  %s1116_s1 = inlined_call_operand.hbm [shape: f32[128,128], index: 1, kind: input, shape index: {}]   ;;  %s1117_s2 = inlined_call_operand.hbm [shape: f32[128,128], index: 2, kind: input, shape index: {}]   ;;  %s1118_s3 = inlined_call_operand.vmem [shape: f32[1,128], index: 3, kind: input, shape index: {}]   ;;  %s1119_s4 = inlined_call_operand.vmem [shape: f32[1,128], index: 4, kind: input, shape index: {}]   ;;  %s1120_s5 = inlined_call_operand.hbm [shape: f32[8,256], index: 5, kind: output, shape index: {}]  }
   0x1   :  { %11 = vsyncpa [#allocation6], 0 }
   0x2   :  { %12 = vsyncpa [#allocation4], 0  ;;  %s923_s18 = smov [#allocation5]   ;;  %s829_s22 = scalar_lea.hbm %s1116_s1, 2048 }
   0x3   :  { %s28_s19 = sshll.u32 %s923_s18, 4  ;;  %p830_p0 = scmp.ne.s32.totalorder %s1116_s1, %s829_s22  ;;  %s29_s19 = int_to_ptr.vmem [resolvable:$true] %s28_s19 }
   0x4   :  { %p833_p1 = scmp.lt.u32.totalorder %s829_s22, %s1116_s1 }
   0x6   :  { %p835_p2 = pnand %p833_p1, %p830_p0 }
   0x8   :  { %838 = shalt.err (!%p835_p2)
}
   0x9   :  { %s839_s27 = scalar_lea.vmem %s29_s19, 2048  ;;  %p844_p4 = scmp.lt.s32.totalorder %s29_s19, %s29_s19 }
   0xa   :  { %p840_p3 = scmp.ne.s32.totalorder %s29_s19, %s839_s27  ;;  %p845_p5 = scmp.lt.s32.totalorder %s839_s27, %s839_s27 }
   0xc   :  { %p846_p6 = por %p845_p5, %p844_p4 }
   0xe   :  { %p847_p7 = pnand %p846_p6, %p840_p3 }
  0x10   :  { %850 = shalt.err (!%p847_p7)
}
  0x11   :  { %s924_s28 = smov 128   ;;  %s925_s29 = smov 8  }
  0x12   :  { %34 = dma.hbm_to_vmem [thread:$0]  %s1116_s1, 2048, %s29_s19, [#allocation6], %s924_s28, %s924_s28, %s925_s29  }
  0x13   :  { %s926_s7 = smov [#allocation2]   ;;  %s927_s9 = smov [#allocation7]  }
  0x14   :  { %s19_s8 = sshll.u32 %s926_s7, 4  ;;  %s40_s10 = sshll.u32 %s927_s9, 4  ;;  %s20_s8 = int_to_ptr.vmem [resolvable:$true] %s19_s8  ;;  %s41_s10 = int_to_ptr.vmem [resolvable:$true] %s40_s10 }
  0x15   :  { %s851_s13 = scalar_lea.hbm %s1115_s0, 512 }
  0x16   :  { %p852_p8 = scmp.ne.s32.totalorder %s1115_s0, %s851_s13  ;;  %p855_p9 = scmp.lt.u32.totalorder %s851_s13, %s1115_s0 }
  0x18   :  { %p857_p10 = pnand %p855_p9, %p852_p8 }
  0x1a   :  { %860 = shalt.err (!%p857_p10)
}
  0x1b   :  { %s861_s1 = scalar_lea.vmem %s20_s8, 512  ;;  %p866_p12 = scmp.lt.s32.totalorder %s20_s8, %s20_s8 }
  0x1c   :  { %p862_p11 = scmp.ne.s32.totalorder %s20_s8, %s861_s1  ;;  %p867_p13 = scmp.lt.s32.totalorder %s861_s1, %s861_s1 }
  0x1e   :  { %p868_p0 = por %p867_p13, %p866_p12 }
  0x20   :  { %p869_p1 = pnand %p868_p0, %p862_p11 }
  0x22   :  { %872 = shalt.err (!%p869_p1)
}
  0x23   :  { %22 = dma.hbm_to_vmem [thread:$0]  %s1115_s0, 512, %s20_s8, [#allocation3]  }
  0x24   :  { %s873_s22 = scalar_lea.hbm %s1117_s2, 2048 }
  0x25   :  { %p874_p2 = scmp.ne.s32.totalorder %s1117_s2, %s873_s22  ;;  %p877_p3 = scmp.lt.u32.totalorder %s873_s22, %s1117_s2 }
  0x27   :  { %p879_p4 = pnand %p877_p3, %p874_p2 }
  0x29   :  { %882 = shalt.err (!%p879_p4)
}
  0x2a   :  { %s883_s27 = scalar_lea.vmem %s41_s10, 2048  ;;  %p888_p6 = scmp.lt.s32.totalorder %s41_s10, %s41_s10 }
  0x2b   :  { %p884_p5 = scmp.ne.s32.totalorder %s41_s10, %s883_s27  ;;  %p889_p7 = scmp.lt.s32.totalorder %s883_s27, %s883_s27 }
  0x2d   :  { %p890_p8 = por %p889_p7, %p888_p6 }
  0x2f   :  { %p891_p9 = pnand %p890_p8, %p884_p5 }
  0x31   :  { %894 = shalt.err (!%p891_p9)
}
  0x32   :  { %46 = dma.hbm_to_vmem [thread:$0]  %s1117_s2, 2048, %s41_s10, [#allocation6], %s924_s28, %s924_s28, %s925_s29  }
  0x33   :  { %917 = dma.done.wait [#allocation3], 512  }
  0x34   :  { %918 = vsyncadd [#allocation3], 4294966784 }
  0x35   :  { %919 = dma.done.wait [#allocation6], 4096  }
  0x36   :  { %920 = vsyncadd [#allocation6], 4294963200  ;;  %v928_v0 = vmov 0.0|0.0   ;;  %vm929_vm0 = vmmov 0   ;;  %v930_v1 = vmov 0.0   ;;  %v1011_v2 = vld [vmem:[#allocation2] sm:$0xff] }
  0x37   :  { %711 = vmatprep.subr.bf16.mxu0 %v928_v0  ;;  %759 = vmatprep.subr.bf16.mxu1 %v928_v0  ;;  %v1013_v3 = vld [vmem:[#allocation2 + $0x10] sm:$0xff]  ;;  %v76_v4 = vld [vmem:[#allocation7] sm:$0xff]  ;;  %v77_v6 = vld [vmem:[#allocation7 + $0x8] sm:$0xff]  ;;  %v237_v9 = vmul.f32 %v1011_v2, %v1011_v2  ;;  %s931_s2 = smov 64   ;;  %vm240_vm1 = vcmask 523264  }
  0x38   :  { %603 = vmatprep.mubr.msk.f32.mxu0 %vm929_vm0, %v930_v1  ;;  %673 = vmatprep.mubr.msk.f32.mxu1 %vm929_vm0, %v930_v1  ;;  %v1017_v5 = vadd.f32 %v1013_v3, %v1011_v2  ;;  %v1019_v7 = vld [vmem:[#allocation2 + $0x8] sm:$0xff]  ;;  %v1021_v8 = vld [vmem:[#allocation2 + $0x18] sm:$0xff]  ;;  %v238_v10 = vmul.f32 %v1013_v3, %v1013_v3  ;;  %v712_v11 = vpack.c.bf16 %v77_v6, %v76_v4  ;;  %v78_v12 = vld [vmem:[#allocation7 + $0x10] sm:$0xff] }
  0x39   :  { %v79_v13 = vld [vmem:[#allocation7 + $0x18] sm:$0xff]  ;;  %v439_v14 = vmul.f32 %v1019_v7, %v1019_v7  ;;  %v440_v15 = vmul.f32 %v1021_v8, %v1021_v8  ;;  %v1034_v16 = vadd.f32 %v1021_v8, %v1019_v7  ;;  %v80_v19 = vld [vmem:[#allocation7 + $0x20] sm:$0xff]  ;;  %v81_v20 = vld [vmem:[#allocation7 + $0x28] sm:$0xff] }
  0x3a   :  { %256 = vrot.lane.b32.xlu0 %v1017_v5, %s931_s2  ;;  %v1036_v17 = vadd.f32 %v238_v10, %v237_v9  ;;  %713 = vmatpush3.bf16.msra.mxu0 %v712_v11  ;;  %v715_v18 = vpack.c.bf16 %v79_v13, %v78_v12  ;;  %v718_v22 = vpack.c.bf16 %v81_v20, %v80_v19  ;;  %v82_v23 = vld [vmem:[#allocation7 + $0x30] sm:$0xff]  ;;  %v83_v24 = vld [vmem:[#allocation7 + $0x38] sm:$0xff]  ;;  %v84_v26 = vld [vmem:[#allocation7 + $0x40] sm:$0xff]  ;;  %v241_v44 = vsel %vm240_vm1, %v1017_v5, 0.0 }
  0x3b   :  { %761 = vmatpush3.bf16.msra.mxu1 %v712_v11  ;;  %714 = vmatprep.subr.bf16.mxu0 %v928_v0  ;;  %v1041_v21 = vadd.f32 %v440_v15, %v439_v14  ;;  %v721_v25 = vpack.c.bf16 %v83_v24, %v82_v23  ;;  %v85_v27 = vld [vmem:[#allocation7 + $0x48] sm:$0xff]  ;;  %v86_v29 = vld [vmem:[#allocation7 + $0x50] sm:$0xff]  ;;  %v87_v30 = vld [vmem:[#allocation7 + $0x58] sm:$0xff]  ;;  %v442_v48 = vsel %vm240_vm1, %v1034_v16, 0.0 }
  0x3c   :  { %762 = vmatprep.subr.bf16.mxu1 %v928_v0  ;;  %263 = vrot.lane.b32.xlu1 %v1036_v17, %s931_s2  ;;  %v724_v28 = vpack.c.bf16 %v85_v27, %v84_v26  ;;  %v727_v31 = vpack.c.bf16 %v87_v30, %v86_v29  ;;  %v88_v32 = vld [vmem:[#allocation7 + $0x60] sm:$0xff]  ;;  %v89_v33 = vld [vmem:[#allocation7 + $0x68] sm:$0xff]  ;;  %v90_v35 = vld [vmem:[#allocation7 + $0x70] sm:$0xff]  ;;  %v244_v51 = vsel %vm240_vm1, %v1036_v17, 0.0 }
  0x3d   :  { %v730_v34 = vpack.c.bf16 %v89_v33, %v88_v32  ;;  %v91_v36 = vld [vmem:[#allocation7 + $0x78] sm:$0xff]  ;;  %v60_v38 = vld [vmem:[#allocation5] sm:$0xff]  ;;  %v61_v39 = vld [vmem:[#allocation5 + $0x8] sm:$0xff]  ;;  %v445_v5 = vsel %vm240_vm1, %v1041_v21, 0.0 }
  0x3e   :  { %457 = vrot.lane.b32.xlu0 %v1034_v16, %s931_s2  ;;  %716 = vmatpush3.bf16.msra.mxu0 %v715_v18  ;;  %v733_v37 = vpack.c.bf16 %v91_v36, %v90_v35  ;;  %v736_v40 = vpack.c.bf16 %v61_v39, %v60_v38  ;;  %v62_v41 = vld [vmem:[#allocation5 + $0x10] sm:$0xff]  ;;  %v63_v42 = vld [vmem:[#allocation5 + $0x18] sm:$0xff]  ;;  %v64_v45 = vld [vmem:[#allocation5 + $0x20] sm:$0xff] }
  0x3f   :  { %764 = vmatpush3.bf16.msra.mxu1 %v715_v18  ;;  %717 = vmatprep.subr.bf16.mxu0 %v928_v0  ;;  %v739_v43 = vpack.c.bf16 %v63_v42, %v62_v41  ;;  %v65_v46 = vld [vmem:[#allocation5 + $0x28] sm:$0xff]  ;;  %v66_v49 = vld [vmem:[#allocation5 + $0x30] sm:$0xff]  ;;  %v67_v50 = vld [vmem:[#allocation5 + $0x38] sm:$0xff] }
  0x40   :  { %765 = vmatprep.subr.bf16.mxu1 %v928_v0  ;;  %464 = vrot.lane.b32.xlu1 %v1041_v21, %s931_s2  ;;  %v742_v47 = vpack.c.bf16 %v65_v46, %v64_v45  ;;  %v745_v52 = vpack.c.bf16 %v67_v50, %v66_v49  ;;  %v68_v53 = vld [vmem:[#allocation5 + $0x40] sm:$0xff]  ;;  %v69_v54 = vld [vmem:[#allocation5 + $0x48] sm:$0xff]  ;;  %v70_v56 = vld [vmem:[#allocation5 + $0x50] sm:$0xff] }
  0x41   :  { %v748_v55 = vpack.c.bf16 %v69_v54, %v68_v53  ;;  %v71_v57 = vld [vmem:[#allocation5 + $0x58] sm:$0xff]  ;;  %v72_v59 = vld [vmem:[#allocation5 + $0x60] sm:$0xff]  ;;  %v73_v60 = vld [vmem:[#allocation5 + $0x68] sm:$0xff] }
  0x42   :  { %719 = vmatpush3.bf16.msra.mxu0 %v718_v22  ;;  %v751_v58 = vpack.c.bf16 %v71_v57, %v70_v56  ;;  %v754_v61 = vpack.c.bf16 %v73_v60, %v72_v59  ;;  %v74_v62 = vld [vmem:[#allocation5 + $0x70] sm:$0xff]  ;;  %v75_v63 = vld [vmem:[#allocation5 + $0x78] sm:$0xff]  ;;  %v502_v57 = vld [vmem:[%s1119_s4] ss:$0 sm:$0xff] }
  0x43   :  { %767 = vmatpush3.bf16.msra.mxu1 %v718_v22  ;;  %720 = vmatprep.subr.bf16.mxu0 %v928_v0 }
  0x44   :  { %768 = vmatprep.subr.bf16.mxu1 %v928_v0 }
  0x46   :  { %722 = vmatpush3.bf16.msra.mxu0 %v721_v25 }
  0x47   :  { %770 = vmatpush3.bf16.msra.mxu1 %v721_v25  ;;  %723 = vmatprep.subr.bf16.mxu0 %v928_v0 }
  0x48   :  { %771 = vmatprep.subr.bf16.mxu1 %v928_v0 }
  0x4a   :  { %725 = vmatpush3.bf16.msra.mxu0 %v724_v28 }
  0x4b   :  { %773 = vmatpush3.bf16.msra.mxu1 %v724_v28  ;;  %726 = vmatprep.subr.bf16.mxu0 %v928_v0 }
  0x4c   :  { %774 = vmatprep.subr.bf16.mxu1 %v928_v0 }
  0x4e   :  { %728 = vmatpush3.bf16.msra.mxu0 %v727_v31 }
  0x4f   :  { %776 = vmatpush3.bf16.msra.mxu1 %v727_v31  ;;  %729 = vmatprep.subr.bf16.mxu0 %v928_v0 }
  0x50   :  { %777 = vmatprep.subr.bf16.mxu1 %v928_v0 }
  0x52   :  { %731 = vmatpush3.bf16.msra.mxu0 %v730_v34 }
  0x53   :  { %779 = vmatpush3.bf16.msra.mxu1 %v730_v34  ;;  %732 = vmatprep.subr.bf16.mxu0 %v928_v0 }
  0x54   :  { %780 = vmatprep.subr.bf16.mxu1 %v928_v0 }
  0x56   :  { %734 = vmatpush3.bf16.msra.mxu0 %v733_v37 }
  0x57   :  { %782 = vmatpush3.bf16.msra.mxu1 %v733_v37  ;;  %735 = vmatprep.subr.bf16.mxu0 %v928_v0 }
  0x58   :  { %783 = vmatprep.subr.bf16.mxu1 %v928_v0 }
  0x59   :  { %604 = vmatmul.mubr.f32.vlgmr.msra.gmra.mrb[0].mxu0 %v1013_v3 }
  0x5a   :  { %674 = vmatmul.mubr.f32.vlgmr.msra.gmra.mrb[0].mxu1 %v1021_v8  ;;  %737 = vmatpush3.bf16.msra.mxu0 %v736_v40 }
  0x5b   :  { %785 = vmatpush3.bf16.msra.mxu1 %v736_v40  ;;  %738 = vmatprep.subr.bf16.mxu0 %v928_v0 }
  0x5c   :  { %786 = vmatprep.subr.bf16.mxu1 %v928_v0  ;;  %638 = vmatprep.mubr.msk.f32.mxu0 %vm929_vm0, %v930_v1 }
  0x5d   :  { %708 = vmatprep.mubr.msk.f32.mxu1 %vm929_vm0, %v930_v1  ;;  %242 = vadd.xlane.f32.xlu0 %v241_v44  ;;  %v757_v1 = vpack.c.bf16 %v75_v63, %v74_v62 }
  0x5e   :  { %740 = vmatpush3.bf16.msra.mxu0 %v739_v43 }
  0x5f   :  { %788 = vmatpush3.bf16.msra.mxu1 %v739_v43  ;;  %741 = vmatprep.subr.bf16.mxu0 %v928_v0 }
  0x60   :  { %789 = vmatprep.subr.bf16.mxu1 %v928_v0 }
  0x61   :  { %443 = vadd.xlane.f32.xlu0 %v442_v48  ;;  %v501_v48 = vld [vmem:[%s1118_s3] ss:$0 sm:$0xff]  ;;  %s932_s3 = smov [#allocation8]  }
  0x62   :  { %743 = vmatpush3.bf16.msra.mxu0 %v742_v47  ;;  %s491_s8 = sshll.u32 %s932_s3, 4  ;;  %s492_s8 = int_to_ptr.vmem [resolvable:$true] %s491_s8 }
  0x63   :  { %791 = vmatpush3.bf16.msra.mxu1 %v742_v47  ;;  %744 = vmatprep.subr.bf16.mxu0 %v928_v0  ;;  %s895_s9 = scalar_lea.vmem %s492_s8, 256  ;;  %p900_p11 = scmp.lt.s32.totalorder %s492_s8, %s492_s8 }
  0x64   :  { %792 = vmatprep.subr.bf16.mxu1 %v928_v0  ;;  %245 = vadd.xlane.f32.xlu1 %v244_v51  ;;  %p896_p10 = scmp.ne.s32.totalorder %s492_s8, %s895_s9  ;;  %p901_p12 = scmp.lt.s32.totalorder %s895_s9, %s895_s9 }
  0x66   :  { %746 = vmatpush3.bf16.msra.mxu0 %v745_v52  ;;  %p902_p13 = por %p901_p12, %p900_p11 }
  0x67   :  { %794 = vmatpush3.bf16.msra.mxu1 %v745_v52  ;;  %747 = vmatprep.subr.bf16.mxu0 %v928_v0 }
  0x68   :  { %795 = vmatprep.subr.bf16.mxu1 %v928_v0  ;;  %p903_p0 = pnand %p902_p13, %p896_p10 }
  0x6a   :  { %749 = vmatpush3.bf16.msra.mxu0 %v748_v55 }
  0x6b   :  { %797 = vmatpush3.bf16.msra.mxu1 %v748_v55  ;;  %750 = vmatprep.subr.bf16.mxu0 %v928_v0 }
  0x6c   :  { %798 = vmatprep.subr.bf16.mxu1 %v928_v0 }
  0x6e   :  { %752 = vmatpush3.bf16.msra.mxu0 %v751_v58 }
  0x6f   :  { %800 = vmatpush3.bf16.msra.mxu1 %v751_v58  ;;  %753 = vmatprep.subr.bf16.mxu0 %v928_v0 }
  0x70   :  { %801 = vmatprep.subr.bf16.mxu1 %v928_v0 }
  0x72   :  { %755 = vmatpush3.bf16.msra.mxu0 %v754_v61 }
  0x73   :  { %803 = vmatpush3.bf16.msra.mxu1 %v754_v61  ;;  %756 = vmatprep.subr.bf16.mxu0 %v928_v0 }
  0x74   :  { %804 = vmatprep.subr.bf16.mxu1 %v928_v0 }
  0x76   :  { %758 = vmatpush3.bf16.msra.mxu0 %v757_v1 }
  0x77   :  { %806 = vmatpush3.bf16.msra.mxu1 %v757_v1 }
  0x79   :  { %639 = vmatmul.mubr.f32.vlgmr.msra.gmra.mrb[0].mxu0 %v1011_v2 }
  0x7a   :  { %709 = vmatmul.mubr.f32.vlgmr.msra.gmra.mrb[0].mxu1 %v1019_v7 }
  0xac   :  { %v257_v3 = vpop.permute.xlu0 %256 }
  0xad   :  { %v259_v4 = vsel %vm240_vm1, %v257_v3, 0.0 }
  0xae   :  { %260 = vadd.xlane.f32.xlu1 %v259_v4  ;;  %v264_v6 = vpop.permute.xlu1 %263 }
  0xaf   :  { %v266_v0 = vsel %vm240_vm1, %v264_v6, 0.0 }
  0xb0   :  { %v458_v8 = vpop.permute.xlu0 %457 }
  0xb1   :  { %v460_v9 = vsel %vm240_vm1, %v458_v8, 0.0 }
  0xb2   :  { %446 = vadd.xlane.f32.xlu1 %v445_v5  ;;  %461 = vadd.xlane.f32.xlu0 %v460_v9  ;;  %v465_v10 = vpop.permute.xlu1 %464 }
  0xb3   :  { %v467_v2 = vsel %vm240_vm1, %v465_v10, 0.0 }
  0xb6   :  { %267 = vadd.xlane.f32.xlu0 %v266_v0 }
  0xba   :  { %468 = vadd.xlane.f32.xlu0 %v467_v2 }
  0xea   :  { %v243_v7 = vpop.xlane.xlu0 %242 }
  0xeb   :  { %v247_v11 = vmul.f32 0.0078125, %v243_v7 }
  0xed   :  { %v249_v14 = vmul.f32 %v247_v11, %v247_v11 }
  0xee   :  { %v444_v13 = vpop.xlane.xlu0 %443 }
  0xef   :  { %v448_v17 = vmul.f32 0.0078125, %v444_v13 }
  0xf1   :  { %v246_v12 = vpop.xlane.xlu1 %245  ;;  %v450_v22 = vmul.f32 %v448_v17, %v448_v17 }
  0xf2   :  { %v248_v15 = vmul.f32 0.0078125, %v246_v12 }
  0xf4   :  { %v250_v18 = vsub.f32 %v248_v15, %v249_v14 }
  0xf6   :  { %v251_v24 = vmax.f32 %v250_v18, 0.0 }
  0xf8   :  { %v252_v30 = vadd.f32 1e-05, %v251_v24 }
  0xfa   :  { %821 = vrsqrt.f32 %v252_v30 }
 0x104   :  { %v822_v46 = vpop.eup %821 }
 0x105   :  { %v254_v49 = vmul.f32 %v822_v46, %v247_v11 }
 0x13b   :  { %v261_v16 = vpop.xlane.xlu1 %260 }
 0x13c   :  { %v269_v21 = vmul.f32 0.0078125, %v261_v16 }
 0x13e   :  { %v271_v27 = vmul.f32 %v269_v21, %v269_v21 }
 0x13f   :  { %v447_v19 = vpop.xlane.xlu1 %446  ;;  %v462_v20 = vpop.xlane.xlu0 %461 }
 0x140   :  { %v449_v23 = vmul.f32 0.0078125, %v447_v19  ;;  %v470_v28 = vmul.f32 0.0078125, %v462_v20 }
 0x142   :  { %v451_v25 = vsub.f32 %v449_v23, %v450_v22  ;;  %v472_v34 = vmul.f32 %v470_v28, %v470_v28 }
 0x143   :  { %v268_v26 = vpop.xlane.xlu0 %267 }
 0x144   :  { %v270_v29 = vmul.f32 0.0078125, %v268_v26  ;;  %v452_v31 = vmax.f32 %v451_v25, 0.0 }
 0x146   :  { %v272_v32 = vsub.f32 %v270_v29, %v271_v27  ;;  %v453_v37 = vadd.f32 1e-05, %v452_v31 }
 0x147   :  { %v469_v33 = vpop.xlane.xlu0 %468 }
 0x148   :  { %v273_v35 = vmax.f32 %v272_v32, 0.0  ;;  %v471_v36 = vmul.f32 0.0078125, %v469_v33 }
 0x14a   :  { %v274_v38 = vadd.f32 1e-05, %v273_v35  ;;  %v473_v39 = vsub.f32 %v471_v36, %v472_v34 }
 0x14c   :  { %823 = vrsqrt.f32 %v274_v38  ;;  %v474_v40 = vmax.f32 %v473_v39, 0.0  ;;  %v232_v41 = vpop.f32.mrb[0].mxu0 }
 0x14d   :  { %v434_v42 = vpop.f32.mrb[0].mxu1  ;;  %825 = vrsqrt.f32 %v453_v37  ;;  %v640_v44 = vpop.f32.mrb[1].mxu0 }
 0x14e   :  { %v475_v43 = vadd.f32 1e-05, %v474_v40  ;;  %v710_v45 = vpop.f32.mrb[1].mxu1 }
 0x150   :  { %827 = vrsqrt.f32 %v475_v43 }
 0x156   :  { %v824_v47 = vpop.eup %823 }
 0x157   :  { %v276_v50 = vmul.f32 %v824_v47, %v269_v21  ;;  %v277_v51 = vsel %vm240_vm1, %v822_v46, %v824_v47  ;;  %v826_v52 = vpop.eup %825 }
 0x158   :  { %v279_v55 = vmul.f32 %v277_v51, %v232_v41  ;;  %v455_v58 = vmul.f32 %v826_v52, %v448_v17 }
 0x159   :  { %v278_v53 = vsel %vm240_vm1, %v254_v49, %v276_v50 }
 0x15a   :  { %v828_v54 = vpop.eup %827  ;;  %v286_v56 = vmul.f32 %v501_v48, %v278_v53 }
 0x15b   :  { %v477_v59 = vmul.f32 %v828_v54, %v470_v28  ;;  %v478_v60 = vsel %vm240_vm1, %v826_v52, %v828_v54 }
 0x15c   :  { %v287_v61 = vsub.f32 %v279_v55, %v286_v56  ;;  %v480_v1 = vmul.f32 %v478_v60, %v434_v42 }
 0x15d   :  { %v479_v62 = vsel %vm240_vm1, %v455_v58, %v477_v59 }
 0x15e   :  { %v294_v63 = vadd.f32 %v502_v57, %v287_v61  ;;  %v481_v3 = vmul.f32 %v501_v48, %v479_v62 }
 0x160   :  { %295 = vst [vmem:[#allocation8] sm:$0xff] %v294_v63  ;;  %v482_v4 = vsub.f32 %v480_v1, %v481_v3 }
 0x162   :  { %v483_v5 = vadd.f32 %v502_v57, %v482_v4 }
 0x164   :  { %484 = vst [vmem:[#allocation8 + $0x8] sm:$0xff] %v483_v5 }
 0x165   :  { %906 = shalt.err (!%p903_p0)
}
 0x166   :  { %s907_s11 = scalar_lea.hbm %s1120_s5, 256 }
 0x167   :  { %p908_p1 = scmp.ne.s32.totalorder %s1120_s5, %s907_s11  ;;  %p911_p2 = scmp.lt.u32.totalorder %s907_s11, %s1120_s5 }
 0x169   :  { %p913_p3 = pnand %p911_p2, %p908_p1 }
 0x16b   :  { %916 = shalt.err (!%p913_p3)
}
 0x16c   :  { %494 = dma.vmem_to_hbm [thread:$0]  %s492_s8, 256, %s1120_s5, [#allocation4]  }
 0x16d   :  { %921 = dma.done.wait [#allocation4], 256  }
 0x16e   :  { %922 = vsyncadd [#allocation4], 4294967040 }
 0x16f   :  { %498 = vsyncpa [#allocation3], 1 }
 0x170   :  { %499 = vsyncpa [#allocation6], 1 }
 0x171   :  { %500 = vsyncpa [#allocation4], 1 }

</bundles_post_ra>
